<compile_context>
chip_gen: v5e
topology: v5e:2x2
jax: 0.10.0
libtpu: 0.0.40
codegen_flags: <defaults>
</compile_context>

<pallas_src>
import jax
import jax.numpy as jnp
from jax.experimental import pallas as pl
from jax.experimental.pallas import tpu as pltpu


def _round_up(x: int, m: int) -> int:
    return ((x + m - 1) // m) * m


def _pad2(x, rows, cols):
    pr, pc = rows - x.shape[0], cols - x.shape[1]
    if pr or pc:
        x = jnp.pad(x, ((0, pr), (0, pc)))
    return x


def _vmem_limit_bytes() -> int:
    """Generation-aware scoped-VMEM limit (64 MiB on 128-MiB parts, 32 MiB on v7x)."""
    default = 32 * 1024 * 1024
    try:
        info = pltpu.get_tpu_info()
        cap = int(getattr(info, "vmem_capacity_bytes", 0) or 0)
        if cap >= 128 * 1024 * 1024:        # v5e / v6e: 128 MiB physical VMEM
            return 64 * 1024 * 1024
        if cap > 0:                         # v7x: 64 MiB physical -> keep 32 MiB scoped
            return min(default, cap // 2)
    except Exception:
        pass
    return default


def _make_modality_sum_kernel(num_feats: int):
    """Elementwise sum of num_feats modality tiles (native dtype). Used only when the
    main matmul cannot keep a single H tile (fallback pre-fusion pass)."""

    def kernel(*refs):
        feat_refs = refs[:num_feats]
        out_ref = refs[num_feats]
        s = feat_refs[0][...]
        for r in feat_refs[1:]:
            s = s + r[...]
        out_ref[...] = s.astype(out_ref.dtype)

    return kernel


def _make_fusion_matmul_kernel(num_feats: int, acc_in_out: bool):
    """(sum of feature tiles) @ W_tile, accumulated over the k (=D) grid axis.

    refs = feat_0..feat_{F-1}, w, b, out[, acc]
      feat_i : (tm, tk)   w : (tk, tn)   b : (1, tn)   out : (tm, tn)
      acc    : (tm, tn) f32 scratch, only when acc_in_out is False.
    1/M is already folded into W; bias is added in the epilogue.
    """

    def kernel(*refs):
        feat_refs = refs[:num_feats]
        w_ref = refs[num_feats]
        b_ref = refs[num_feats + 1]
        out_ref = refs[num_feats + 2]
        acc_ref = out_ref if acc_in_out else refs[num_feats + 3]
        k = pl.program_id(2)

        @pl.when(k == 0)
        def _init():
            acc_ref[...] = jnp.zeros_like(acc_ref)

        # Modality sum in the native MXU operand dtype (no scale, no f32 round-trip).
        fused = feat_refs[0][...]
        for r in feat_refs[1:]:
            fused = fused + r[...]

        acc_ref[...] += jnp.dot(fused, w_ref[...], preferred_element_type=jnp.float32)

        @pl.when(k == pl.num_programs(2) - 1)
        def _finalize():
            if acc_in_out:
                out_ref[...] = acc_ref[...] + b_ref[...].astype(jnp.float32)
            else:
                out_ref[...] = (
                    acc_ref[...] + b_ref[...].astype(jnp.float32)
                ).astype(out_ref.dtype)

    return kernel


def fusion_forward(features, w, b, *, mxu_dtype=None):
    """Concrete BaseFusionModule.forward.

    Args:
      features: dict[str, (B, D) array] — per-modality features (same B, D).
      w: (D, H) projection weight.
      b: (H,) projection bias.
      mxu_dtype: optional dtype for the dot operands (e.g. jnp.bfloat16 on v5e).

    Returns:
      (B, H) fused, projected features: mean(features) @ w + b.
    """
    keys = sorted(features.keys())             # deterministic dict ordering
    feats = [features[name] for name in keys]
    M = len(feats)
    B, D = feats[0].shape
    Dw, H = w.shape
    assert D == Dw, (D, Dw)

    out_dtype = feats[0].dtype
    op_dtype = (
        jnp.dtype(mxu_dtype)
        if mxu_dtype is not None
        else jnp.promote_types(out_dtype, w.dtype)
    )
    in_isz = jnp.dtype(op_dtype).itemsize
    out_isz = jnp.dtype(out_dtype).itemsize
    use_acc = out_dtype != jnp.float32        # f32 output accumulates in-place

    # ---- generation-aware VMEM budget & tile selection -------------------------
    budget = _vmem_limit_bytes()
    headroom = int(budget * 0.75)             # leave room for compiler internals

    Bp8 = _round_up(B, 8)
    Dp0 = _round_up(D, 128)
    Hp0 = _round_up(H, 128)

    def _footprint(nf, tm, tn, tk):
        buf = 2 * (nf * tm * tk + tk * tn + tn) * in_isz    # double-buffered inputs
        buf += 2 * tm * tn * out_isz                        # double-buffered output
        if use_acc:
            buf += tm * tn * 4                              # f32 accumulator scratch
        return buf

    tm = min(512, Bp8)
    tk = min(1024, Dp0)
    # Prefer a single output-column tile: features stream exactly once and the modality
    # fusion stays fully in-kernel.
    tn = Hp0 if _footprint(M, tm, Hp0, tk) <= headroom else min(512, Hp0)
    while _footprint(M, tm, tn, tk) > headroom:
        if tk > 128:
            tk = max(128, (tk // 2) // 128 * 128)
        elif tn > 128:
            tn = max(128, (tn // 2) // 128 * 128)
        elif tm > 8:
            tm = max(8, (tm // 2) // 8 * 8)
        else:
            break

    Bp = _round_up(B, tm)
    Dp = _round_up(D, tk)
    Hp = _round_up(H, tn)
    n_i, n_j, n_k = Bp // tm, Hp // tn, Dp // tk

    # ---- pad / cast operands (skipped when already aligned) --------------------
    feats_p = [_pad2(f.astype(op_dtype), Bp, Dp) for f in feats]   # zero pad: inert
    # Fold the 1/M mean scale into the weight copy that already happens here.
    w_p = _pad2((w.astype(jnp.float32) * (1.0 / M)).astype(op_dtype), Dp, Hp)
    b_p = _pad2(b.astype(jnp.float32).reshape(1, H), 1, Hp)

    # ---- fallback: pre-fuse modalities once when H spans multiple column tiles --
    if M > 1 and n_j > 1:
        fused_p = pl.pallas_call(
            _make_modality_sum_kernel(M),
            out_shape=jax.ShapeDtypeStruct((Bp, Dp), op_dtype),
            grid_spec=pltpu.PrefetchScalarGridSpec(
                num_scalar_prefetch=0,
                grid=(n_i, n_k),
                in_specs=[pl.BlockSpec((tm, tk), lambda i, j: (i, j))] * M,
                out_specs=pl.BlockSpec((tm, tk), lambda i, j: (i, j)),
            ),
            compiler_params=pltpu.CompilerParams(
                dimension_semantics=("parallel", "parallel"),
                vmem_limit_bytes=budget,
            ),
        )(*feats_p)
        mm_feats = [fused_p]
    else:
        mm_feats = feats_p
    F = len(mm_feats)

    # ---- main matmul + bias kernel ----------------------------------------------
    feat_spec = pl.BlockSpec((tm, tk), lambda i, j, k: (i, k))
    in_specs = [feat_spec] * F + [
        pl.BlockSpec((tk, tn), lambda i, j, k: (k, j)),     # W (pre-scaled by 1/M)
        pl.BlockSpec((1, tn), lambda i, j, k: (0, j)),      # bias
    ]
    out_spec = pl.BlockSpec((tm, tn), lambda i, j, k: (i, j))
    scratch = [pltpu.VMEM((tm, tn), jnp.float32)] if use_acc else []

    # Bytes reflect the actual tiled traffic (features re-read n_j times, W n_i times).
    cost = pl.CostEstimate(
        flops=2 * Bp * Dp * Hp + (F - 1) * Bp * Dp * n_j,
        transcendentals=0,
        bytes_accessed=(
            F * Bp * Dp * in_isz * n_j
            + Dp * Hp * in_isz * n_i
            + Bp * Hp * out_isz
            + Hp * 4 * n_i
        ),
    )

    out_p = pl.pallas_call(
        _make_fusion_matmul_kernel(F, acc_in_out=not use_acc),
        out_shape=jax.ShapeDtypeStruct((Bp, Hp), out_dtype),
        grid_spec=pltpu.PrefetchScalarGridSpec(
            num_scalar_prefetch=0,
            grid=(n_i, n_j, n_k),
            in_specs=in_specs,
            out_specs=out_spec,
            scratch_shapes=scratch,
        ),
        compiler_params=pltpu.CompilerParams(
            dimension_semantics=("parallel", "parallel", "arbitrary"),
            vmem_limit_bytes=budget,
        ),
        cost_estimate=cost,
    )(*mm_feats, w_p, b_p)

    return out_p[:B, :H]


def _reference(features, w, b):
    keys = sorted(features.keys())
    stacked = jnp.stack([features[k].astype(jnp.float32) for k in keys], axis=0)
    fused = jnp.mean(stacked, axis=0)
    out = fused @ w.astype(jnp.float32) + b.astype(jnp.float32)
    return out.astype(features[keys[0]].dtype)


if __name__ == "__main__":
    key = jax.random.PRNGKey(0)
    k_img, k_txt, k_aud, k_w, k_b = jax.random.split(key, 5)

    B, D, H = 8, 32, 32   # small (batch, feature) shapes consistent with the module
    features = {
        "image": jax.random.normal(k_img, (B, D), dtype=jnp.float32),
        "text":  jax.random.normal(k_txt, (B, D), dtype=jnp.float32),
        "audio": jax.random.normal(k_aud, (B, D), dtype=jnp.float32),
    }
    # Deterministic "learned" parameters (synthetic init, no checkpoint load).
    w = jax.random.normal(k_w, (D, H), dtype=jnp.float32) * 0.05
    b = jax.random.normal(k_b, (H,), dtype=jnp.float32) * 0.01

    out = fusion_forward(features, w, b)
    out = jax.block_until_ready(out)

    ref = _reference(features, w, b)
    assert out.shape == (B, H), out.shape
    assert jnp.allclose(out, ref, atol=1e-4, rtol=1e-4), "mismatch vs reference"
    print("KERNEL_OK")
</pallas_src>

<mosaic_0001>
module attributes {stable_mosaic.version = 11 : i64} {
  func.func @kernel(%arg0: i32, %arg1: i32, %arg2: i32, %arg3: memref<8x128xf32, #tpu.memory_space<vmem>>, %arg4: memref<8x128xf32, #tpu.memory_space<vmem>>, %arg5: memref<8x128xf32, #tpu.memory_space<vmem>>, %arg6: memref<128x128xf32, #tpu.memory_space<vmem>>, %arg7: memref<1x128xf32, #tpu.memory_space<vmem>>, %arg8: memref<8x128xf32, #tpu.memory_space<vmem>>) attributes {dimension_semantics = [#tpu.dimension_semantics<parallel>, #tpu.dimension_semantics<parallel>, #tpu.dimension_semantics<arbitrary>], iteration_bounds = array<i64: 1, 1, 1>, scalar_prefetch = 0 : i64, scratch_operands = 0 : i64, tpu.core_type = #tpu.core_type<tc>, window_params = [{transform_indices = @transform_0, window_bounds = array<i64: 8, 128>}, {transform_indices = @transform_1, window_bounds = array<i64: 8, 128>}, {transform_indices = @transform_2, window_bounds = array<i64: 8, 128>}, {transform_indices = @transform_3, window_bounds = array<i64: 128, 128>}, {transform_indices = @transform_4, window_bounds = array<i64: 1, 128>}, {transform_indices = @transform_5, window_bounds = array<i64: 8, 128>}]} {
    %c0_i32 = arith.constant 0 : i32
    %0 = arith.cmpi eq, %arg2, %c0_i32 : i32
    %1 = arith.extui %0 : i1 to i32
    %c0_i32_0 = arith.constant 0 : i32
    %2 = arith.cmpi ne, %1, %c0_i32_0 : i32
    scf.if %2 {
      %cst_14 = arith.constant 0.000000e+00 : f32
      %16 = vector.broadcast %cst_14 : f32 to vector<8x128xf32>
      %c0_15 = arith.constant 0 : index
      %c0_16 = arith.constant 0 : index
      %17 = vector.load %arg8[%c0_15, %c0_16] : memref<8x128xf32, #tpu.memory_space<vmem>>, vector<8x128xf32>
      tpu.vector_store %arg8[%c0_15, %c0_16], %16 {strides = array<i32>} : memref<8x128xf32, #tpu.memory_space<vmem>>, vector<8x128xf32>,
    } else {
    }
    %c0 = arith.constant 0 : index
    %c0_1 = arith.constant 0 : index
    %3 = vector.load %arg3[%c0, %c0_1] : memref<8x128xf32, #tpu.memory_space<vmem>>, vector<8x128xf32>
    %c0_2 = arith.constant 0 : index
    %c0_3 = arith.constant 0 : index
    %4 = vector.load %arg4[%c0_2, %c0_3] : memref<8x128xf32, #tpu.memory_space<vmem>>, vector<8x128xf32>
    %5 = arith.addf %3, %4 : vector<8x128xf32>
    %c0_4 = arith.constant 0 : index
    %c0_5 = arith.constant 0 : index
    %6 = vector.load %arg5[%c0_4, %c0_5] : memref<8x128xf32, #tpu.memory_space<vmem>>, vector<8x128xf32>
    %7 = arith.addf %5, %6 : vector<8x128xf32>
    %c0_6 = arith.constant 0 : index
    %c0_7 = arith.constant 0 : index
    %8 = vector.load %arg8[%c0_6, %c0_7] : memref<8x128xf32, #tpu.memory_space<vmem>>, vector<8x128xf32>
    %c0_8 = arith.constant 0 : index
    %c0_9 = arith.constant 0 : index
    %9 = vector.load %arg6[%c0_8, %c0_9] : memref<128x128xf32, #tpu.memory_space<vmem>>, vector<128x128xf32>
    %cst = arith.constant dense<0.000000e+00> : vector<8x128xf32>
    %10 = tpu.matmul %7, %9, %cst {dimension_numbers = #tpu.dot_dimension_numbers<[1], [0], [0], [1], [0, 0, 1, 1], [], []>} : vector<8x128xf32>, vector<128x128xf32>, vector<8x128xf32> -> vector<8x128xf32>
    %11 = arith.addf %8, %10 : vector<8x128xf32>
    %c0_10 = arith.constant 0 : index
    %c0_11 = arith.constant 0 : index
    %12 = vector.load %arg8[%c0_10, %c0_11] : memref<8x128xf32, #tpu.memory_space<vmem>>, vector<8x128xf32>
    tpu.vector_store %arg8[%c0_10, %c0_11], %11 {strides = array<i32>} : memref<8x128xf32, #tpu.memory_space<vmem>>, vector<8x128xf32>,
    %c0_i32_12 = arith.constant 0 : i32
    %13 = arith.cmpi eq, %arg2, %c0_i32_12 : i32
    %14 = arith.extui %13 : i1 to i32
    %c0_i32_13 = arith.constant 0 : i32
    %15 = arith.cmpi ne, %14, %c0_i32_13 : i32
    scf.if %15 {
      %c0_14 = arith.constant 0 : index
      %c0_15 = arith.constant 0 : index
      %16 = vector.load %arg8[%c0_14, %c0_15] : memref<8x128xf32, #tpu.memory_space<vmem>>, vector<8x128xf32>
      %c0_16 = arith.constant 0 : index
      %c0_17 = arith.constant 0 : index
      %17 = vector.load %arg7[%c0_16, %c0_17] : memref<1x128xf32, #tpu.memory_space<vmem>>, vector<1x128xf32>
      %18 = vector.broadcast %17 : vector<1x128xf32> to vector<8x128xf32>
      %19 = arith.addf %16, %18 : vector<8x128xf32>
      %c0_18 = arith.constant 0 : index
      %c0_19 = arith.constant 0 : index
      %20 = vector.load %arg8[%c0_18, %c0_19] : memref<8x128xf32, #tpu.memory_space<vmem>>, vector<8x128xf32>
      tpu.vector_store %arg8[%c0_18, %c0_19], %19 {strides = array<i32>} : memref<8x128xf32, #tpu.memory_space<vmem>>, vector<8x128xf32>,
    } else {
    }
    return
  }
  func.func @transform_0(%arg0: i32, %arg1: i32, %arg2: i32) -> (i32, i32) {
    %c0_i32 = arith.constant 0 : i32
    return %arg0, %arg2 : i32, i32
  }
  func.func @transform_1(%arg0: i32, %arg1: i32, %arg2: i32) -> (i32, i32) {
    %c0_i32 = arith.constant 0 : i32
    return %arg0, %arg2 : i32, i32
  }
  func.func @transform_2(%arg0: i32, %arg1: i32, %arg2: i32) -> (i32, i32) {
    %c0_i32 = arith.constant 0 : i32
    return %arg0, %arg2 : i32, i32
  }
  func.func @transform_3(%arg0: i32, %arg1: i32, %arg2: i32) -> (i32, i32) {
    %c0_i32 = arith.constant 0 : i32
    return %arg2, %arg1 : i32, i32
  }
  func.func @transform_4(%arg0: i32, %arg1: i32, %arg2: i32) -> (i32, i32) {
    %c0_i32 = arith.constant 0 : i32
    %c0_i32_0 = arith.constant 0 : i32
    return %c0_i32, %arg1 : i32, i32
  }
  func.func @transform_5(%arg0: i32, %arg1: i32, %arg2: i32) -> (i32, i32) {
    %c0_i32 = arith.constant 0 : i32
    return %arg0, %arg1 : i32, i32
  }
}

</mosaic_0001>

<bundles_post_ra>
// kernel: tpu_custom_call.1
= control target key start
LH: loop header
LB: loop body
LE: loop exit
PB: predicated region body
PF: predicated region fallthrough
CT: control target
= control target key end

     0   :  { %10 = vsyncpa [#allocation3], 0  ;;  %s348_s0 = inlined_call_operand.hbm [shape: f32[8,128], index: 0, kind: input, shape index: {}]   ;;  %s349_s1 = inlined_call_operand.hbm [shape: f32[8,128], index: 1, kind: input, shape index: {}]   ;;  %s350_s2 = inlined_call_operand.hbm [shape: f32[8,128], index: 2, kind: input, shape index: {}]   ;;  %s351_s3 = inlined_call_operand.hbm [shape: f32[128,128], index: 3, kind: input, shape index: {}]   ;;  %s352_s4 = inlined_call_operand.vmem [shape: f32[1,128], index: 4, kind: input, shape index: {}]   ;;  %s353_s5 = inlined_call_operand.hbm [shape: f32[8,128], index: 5, kind: output, shape index: {}]  }
   0x1   :  { %11 = vsyncpa [#allocation6], 0 }
   0x2   :  { %12 = vsyncpa [#allocation9], 0  ;;  %s30_s20 = sshll.u32 %s349_s1, 4  ;;  %s31_s20 = int_to_ptr.hbm [resolvable:$true] %s30_s20 }
   0x3   :  { %13 = vsyncpa [#allocation4], 0  ;;  %s293_s21 = smov [#allocation5]   ;;  %s19_s25 = sshll.u32 %s348_s0, 4  ;;  %s20_s25 = int_to_ptr.hbm [resolvable:$true] %s19_s25 }
   0x4   :  { %s32_s22 = sshll.u32 %s293_s21, 4  ;;  %s294_s26 = smov [#allocation2]   ;;  %s33_s22 = int_to_ptr.vmem [resolvable:$true] %s32_s22 }
   0x5   :  { %35 = dma.hbm_to_vmem [thread:$0]  %s31_s20, 128, %s33_s22, [#allocation6]  }
   0x6   :  { %s21_s27 = sshll.u32 %s294_s26, 4  ;;  %s41_s30 = sshll.u32 %s350_s2, 4  ;;  %s22_s27 = int_to_ptr.vmem [resolvable:$true] %s21_s27  ;;  %s42_s30 = int_to_ptr.hbm [resolvable:$true] %s41_s30 }
   0x7   :  { %24 = dma.hbm_to_vmem [thread:$0]  %s20_s25, 128, %s22_s27, [#allocation3]  }
   0x8   :  { %s51_s7 = sshll.u32 %s351_s3, 4  ;;  %s295_s8 = smov [#allocation7]   ;;  %s52_s7 = int_to_ptr.hbm [resolvable:$true] %s51_s7 }
   0x9   :  { %s43_s9 = sshll.u32 %s295_s8, 4  ;;  %s296_s0 = smov [#allocation8]   ;;  %s44_s9 = int_to_ptr.vmem [resolvable:$true] %s43_s9 }
   0xa   :  { %46 = dma.hbm_to_vmem [thread:$0]  %s42_s30, 128, %s44_s9, [#allocation6]  }
   0xb   :  { %s53_s10 = sshll.u32 %s296_s0, 4  ;;  %s297_s11 = smov 128   ;;  %s54_s10 = int_to_ptr.vmem [resolvable:$true] %s53_s10 }
   0xc   :  { %s298_s12 = smov 8  }
   0xd   :  { %59 = dma.hbm_to_vmem [thread:$0]  %s52_s7, 2048, %s54_s10, [#allocation9], %s297_s11, %s297_s11, %s298_s12  }
   0xe   :  { %285 = dma.done.wait [#allocation3], 128  }
   0xf   :  { %286 = vsyncadd [#allocation3], 4294967168 }
  0x10   :  { %287 = dma.done.wait [#allocation6], 256  }
  0x11   :  { %288 = vsyncadd [#allocation6], 4294967040 }
  0x12   :  { %289 = dma.done.wait [#allocation9], 2048  }
  0x13   :  { %290 = vsyncadd [#allocation9], 4294965248  ;;  %v104_v0 = vld [vmem:[#allocation8 + $0x78] sm:$0xff]  ;;  %v103_v1 = vld [vmem:[#allocation8 + $0x70] sm:$0xff]  ;;  %s299_s13 = smov [#allocation10]   ;;  %s144_s17 = sshll.u32 %s353_s5, 4  ;;  %s145_s17 = int_to_ptr.hbm [resolvable:$true] %s144_s17 }
  0x14   :  { %105 = vmatpush.msra.mxu0 %v104_v0  ;;  %v102_v2 = vld [vmem:[#allocation8 + $0x68] sm:$0xff]  ;;  %v101_v3 = vld [vmem:[#allocation8 + $0x60] sm:$0xff]  ;;  %v100_v4 = vld [vmem:[#allocation8 + $0x58] sm:$0xff]  ;;  %s142_s14 = sshll.u32 %s299_s13, 4  ;;  %s143_s14 = int_to_ptr.vmem [resolvable:$true] %s142_s14 }
  0x15   :  { %v99_v5 = vld [vmem:[#allocation8 + $0x50] sm:$0xff]  ;;  %v98_v6 = vld [vmem:[#allocation8 + $0x48] sm:$0xff]  ;;  %v97_v7 = vld [vmem:[#allocation8 + $0x40] sm:$0xff] }
  0x16   :  { %106 = vmatpush.msra.mxu0 %v103_v1  ;;  %v96_v8 = vld [vmem:[#allocation8 + $0x38] sm:$0xff]  ;;  %v95_v9 = vld [vmem:[#allocation8 + $0x30] sm:$0xff]  ;;  %v94_v10 = vld [vmem:[#allocation8 + $0x28] sm:$0xff] }
  0x17   :  { %v93_v11 = vld [vmem:[#allocation8 + $0x20] sm:$0xff]  ;;  %v83_v12 = vld [vmem:[#allocation2] sm:$0xff]  ;;  %v84_v13 = vld [vmem:[#allocation5] sm:$0xff] }
  0x18   :  { %107 = vmatpush.msra.mxu0 %v102_v2  ;;  %v92_v14 = vld [vmem:[#allocation8 + $0x18] sm:$0xff]  ;;  %v91_v15 = vld [vmem:[#allocation8 + $0x10] sm:$0xff]  ;;  %v85_v16 = vadd.f32 %v84_v13, %v83_v12  ;;  %v90_v18 = vld [vmem:[#allocation8 + $0x8] sm:$0xff] }
  0x19   :  { %v86_v17 = vld [vmem:[#allocation7] sm:$0xff]  ;;  %v89_v19 = vld [vmem:[#allocation8] sm:$0xff]  ;;  %v164_v21 = vld [vmem:[%s352_s4] ss:$0 sm:$0xff] }
  0x1a   :  { %108 = vmatpush.msra.mxu0 %v101_v3  ;;  %v87_v20 = vadd.f32 %v86_v17, %v85_v16 }
  0x1c   :  { %109 = vmatpush.msra.mxu0 %v100_v4 }
  0x1e   :  { %110 = vmatpush.msra.mxu0 %v99_v5 }
  0x20   :  { %111 = vmatpush.msra.mxu0 %v98_v6 }
  0x22   :  { %112 = vmatpush.msra.mxu0 %v97_v7 }
  0x24   :  { %113 = vmatpush.msra.mxu0 %v96_v8 }
  0x26   :  { %114 = vmatpush.msra.mxu0 %v95_v9 }
  0x28   :  { %115 = vmatpush.msra.mxu0 %v94_v10 }
  0x2a   :  { %116 = vmatpush.msra.mxu0 %v93_v11 }
  0x2c   :  { %117 = vmatpush.msra.mxu0 %v92_v14 }
  0x2e   :  { %118 = vmatpush.msra.mxu0 %v91_v15 }
  0x30   :  { %119 = vmatpush.msra.mxu0 %v90_v18 }
  0x32   :  { %120 = vmatpush.msra.mxu0 %v89_v19 }
  0x33   :  { %121 = vmatmul.f32.vlgmr.msra.gmra.mxu0 %v87_v20 }
  0xb0   :  { %v122_v22 = vpop.f32.mrf.mxu0 }
  0xb1   :  { %v135_v23 = vadd.f32 %v164_v21, %v122_v22 }
  0xb3   :  { %136 = vst [vmem:[#allocation10] sm:$0xff] %v135_v23 }
  0xb4   :  { %147 = dma.vmem_to_hbm [thread:$0]  %s143_s14, 128, %s145_s17, [#allocation4]  }
  0xb5   :  { %291 = dma.done.wait [#allocation4], 128  }
  0xb6   :  { %292 = vsyncadd [#allocation4], 4294967168 }
  0xb7   :  { %152 = vsyncpa [#allocation3], 1 }
  0xb8   :  { %153 = vsyncpa [#allocation6], 1 }
  0xb9   :  { %154 = vsyncpa [#allocation9], 1 }
  0xba   :  { %155 = vsyncpa [#allocation4], 1 }

</bundles_post_ra>
